<compile_context>
chip_gen: v7x
topology: tpu7x:2x2x1
jax: 0.10.0
libtpu: 0.0.40
codegen_flags: <defaults>
</compile_context>

<pallas_src>
import functools

import jax
import jax.numpy as jnp
from jax import lax
from jax.experimental import pallas as pl
from jax.experimental.pallas import tpu as pltpu

EPS = 1e-5
COMPUTE_DTYPE = jnp.bfloat16     # MXU operand / staging / inter-layer activation dtype
LPAD = 16                        # left pad rows of the staging slab -> 16-aligned stores


# ---------------------------------------------------------------------------
# Kernel 1: per-channel batch statistics for the FIRST BatchNorm of the stage.
# (All later BatchNorms get their stats from the fused conv epilogue.)
# ---------------------------------------------------------------------------
def _bn_stats_kernel(x_ref, sum_ref, sq_ref, *, R, TR):
    i = pl.program_id(0)

    @pl.when(i == 0)
    def _():
        sum_ref[...] = jnp.zeros_like(sum_ref)
        sq_ref[...] = jnp.zeros_like(sq_ref)

    xb = x_ref[...].astype(jnp.float32)                    # (TR, C)
    if R % TR:                                             # mask the ragged tail block
        rows = lax.broadcasted_iota(jnp.int32, xb.shape, 0) + i * TR
        xb = jnp.where(rows < R, xb, 0.0)
    sum_ref[...] += jnp.sum(xb, axis=0, keepdims=True)
    sq_ref[...] += jnp.sum(xb * xb, axis=0, keepdims=True)


def bn_batch_stats(x_flat):
    """Per-channel mean / biased variance of a (N, H*W, C) activation."""
    N, HW, C = x_flat.shape
    R = N * HW
    x2 = x_flat.reshape(R, C)                              # no host-side pad pass
    TR = 1024 if R >= 1024 else R                          # big tiles ~ HBM roofline

    sums, sqs = pl.pallas_call(
        functools.partial(_bn_stats_kernel, R=R, TR=TR),
        out_shape=(jax.ShapeDtypeStruct((1, C), jnp.float32),
                   jax.ShapeDtypeStruct((1, C), jnp.float32)),
        grid=(pl.cdiv(R, TR),),
        in_specs=[pl.BlockSpec((TR, C), lambda i: (i, 0))],
        out_specs=(pl.BlockSpec((1, C), lambda i: (0, 0)),
                   pl.BlockSpec((1, C), lambda i: (0, 0))),
        compiler_params=pltpu.CompilerParams(
            dimension_semantics=("arbitrary",)),
    )(x2)

    mean = sums[0] / R
    # TODO(synk): E[x^2]-E[x]^2 can cancel when |mean| >> std at very large N*H*W;
    # switch to a shifted two-pass accumulation if tolerances tighten.
    var = jnp.maximum(sqs[0] / R - mean * mean, 0.0)       # biased variance
    return mean, var


# ---------------------------------------------------------------------------
# Kernel 2: fused  BN(affine) -> ReLU -> 3x3 conv (stride 1 or 2, 'same' pad)
#           + epilogue producing per-strip batch statistics of the layer output.
# ---------------------------------------------------------------------------
def _bn_relu_conv_kernel(x_ref, scale_ref, shift_ref, w_ref, b_ref,
                         o_ref, sum_ref, sq_ref,
                         a_ref, col_ref, *, H, W, SR, stride, pitch):
    W_out = W // stride
    Cin = x_ref.shape[2]
    n_in = stride * SR + 3 - stride          # padded input rows feeding this strip
    r = pl.program_id(1)
    row0 = stride * r * SR                   # first original image row of this strip

    def hint(v):                             # alignment hints for dynamic row starts
        if W % 16 == 0:
            return pl.multiple_of(v, 16)
        if W % 8 == 0:
            return pl.multiple_of(v, 8)
        return v

    scale = scale_ref[...]                   # (1, Cin) f32
    shift = shift_ref[...]

    # One-time (per image) clear of the staging slab.  Only the never-written pad
    # columns actually need it -- the data columns are fully rewritten every strip --
    # but a whole-slab clear once per image is cheap and simple.  The strip axis is
    # "arbitrary", so r == 0 runs before the other strips of this image on its core.
    @pl.when(r == 0)
    def _():
        a_ref[...] = jnp.zeros_like(a_ref)

    def bn_relu(v):                          # f32 math; caller casts to bf16 for staging
        return jnp.maximum(v * scale + shift, 0.0)

    # ---- bulk rows (always in range): ONE big load + ONE VPU pass, then 16-aligned
    #      placement stores into the padded bf16 slab.
    bulk = bn_relu(x_ref[0, pl.ds(hint(row0 * W), (n_in - 2) * W), :]).astype(a_ref.dtype)
    for li in range(1, n_in - 1):
        a_ref[li * pitch + LPAD: li * pitch + LPAD + W, :] = bulk[(li - 1) * W: li * W, :]

    # ---- top / bottom halo rows: clamp the read, zero the padding via a mask.
    for li, orow in ((0, row0 - 1), (n_in - 1, row0 + n_in - 2)):
        valid = jnp.logical_and(orow >= 0, orow < H).astype(jnp.float32)
        xr = x_ref[0, pl.ds(hint(jnp.clip(orow, 0, H - 1) * W), W), :]
        a_ref[li * pitch + LPAD: li * pitch + LPAD + W, :] = (
            bn_relu(xr) * valid).astype(a_ref.dtype)

    # ---- im2col: pack the 9 taps side by side -> (SR*W_out, 9*Cin) bf16 slab, so the
    #      conv is a single MXU matmul; stride folded into the tap reads.
    # TODO(synk): for Cin >= 128 replace this with 9 accumulated K=Cin dots straight
    # off a_ref (compute-the-halo) to avoid the 9x VMEM copy traffic.
    for tap in range(9):
        ky, kx = divmod(tap, 3)
        for i in range(SR):
            src = (stride * i + ky) * pitch + (LPAD - 1) + kx
            if stride == 1:
                patch = a_ref[src: src + W_out, :]
            else:
                patch = a_ref[pl.ds(src, W_out, stride=stride), :]
            col_ref[i * W_out:(i + 1) * W_out, tap * Cin:(tap + 1) * Cin] = patch

    # ---- single MXU matmul (bf16 x bf16 -> f32 accumulate) + bias
    y = jnp.dot(col_ref[...], w_ref[...], preferred_element_type=jnp.float32)
    y = y + b_ref[...]

    # ---- per-strip partial batch statistics of this layer's f32 output
    #      (reduced across strips / images in the wrapper; feeds the next BN).
    sum_ref[0, 0] = jnp.sum(y, axis=0, keepdims=True)
    sq_ref[0, 0] = jnp.sum(y * y, axis=0, keepdims=True)

    o_ref[0] = y.astype(o_ref.dtype)         # bf16 inter-layer activation (f32 last layer)


def _pick_strip_rows(h_out, w_out, target_m=256):
    """Largest divisor SR of h_out with an MXU-friendly strip: SR*w_out <= target_m
    and SR*w_out a multiple of 16 (bf16 sublane packing), else the whole image."""
    best = None
    for sr in range(1, h_out + 1):
        if h_out % sr:
            continue
        if sr * w_out > target_m:
            break
        if (sr * w_out) % 16 == 0 or sr == h_out:
            best = sr
    return best if best is not None else h_out


def bn_relu_conv(x_flat, H, W, gamma, beta, w_hwio, b, stride, stats=None,
                 out_dtype=COMPUTE_DTYPE, target_m=256):
    """y = conv3x3(relu(batchnorm(x))), stride in {1,2}, 'same' padding.

    x_flat: (N, H*W, Cin) flattened-NHWC activation (f32 or bf16).
    stats : optional (mean, var) of x from the previous layer's fused epilogue.
    Returns (y_flat, H_out, W_out, (mean_y, var_y)).
    """
    N, HW, Cin = x_flat.shape
    assert HW == H * W and H % stride == 0 and W % stride == 0
    Cout = w_hwio.shape[-1]

    mean, var = bn_batch_stats(x_flat) if stats is None else stats
    sc = (gamma / jnp.sqrt(var + EPS)).astype(jnp.float32)
    sh = (beta - mean * sc).astype(jnp.float32)
    scale = sc.reshape(1, Cin)
    shift = sh.reshape(1, Cin)

    H_out, W_out = H // stride, W // stride
    # target_m ~256 suits both the v5e 128^2 and v6e/v7x 256^2 MXUs; raise toward 512
    # on v6e if VMEM headroom allows.
    SR = _pick_strip_rows(H_out, W_out, target_m)
    n_strips = H_out // SR
    Ls = SR * W_out
    n_in = stride * SR + 3 - stride
    pitch = -(-(W + LPAD + 1) // 16) * 16          # 16-aligned row pitch of staging slab

    # im2col weight slab: row index = (ky*3+kx)*Cin + ci  (matches col layout)
    w_mat = w_hwio.reshape(9 * Cin, Cout).astype(COMPUTE_DTYPE)
    bias = b.reshape(1, Cout).astype(jnp.float32)

    # VMEM budget from actual buffer sizes (double-buffered I/O + scratch) + headroom.
    vmem_need = (2 * HW * Cin * x_flat.dtype.itemsize
                 + 2 * Ls * Cout * jnp.dtype(out_dtype).itemsize
                 + 2 * 9 * Cin * Cout * 2
                 + (n_in * pitch * Cin + Ls * 9 * Cin) * 2
                 + (4 << 20))
    vmem_limit = int(min(100 << 20, max(32 << 20, vmem_need)))
    # TODO(synk): for very large images (v7x: 64 MiB VMEM) replace the resident-image
    # in_spec with a per-strip row window + 1-row halo and re-derive this budget.

    kern = functools.partial(_bn_relu_conv_kernel,
                             H=H, W=W, SR=SR, stride=stride, pitch=pitch)
    y, s1, s2 = pl.pallas_call(
        kern,
        out_shape=(jax.ShapeDtypeStruct((N, H_out * W_out, Cout), out_dtype),
                   jax.ShapeDtypeStruct((N, n_strips, 1, Cout), jnp.float32),
                   jax.ShapeDtypeStruct((N, n_strips, 1, Cout), jnp.float32)),
        grid=(N, n_strips),
        in_specs=[
            pl.BlockSpec((1, HW, Cin), lambda n, r: (n, 0, 0)),       # image stays resident
            pl.BlockSpec((1, Cin), lambda n, r: (0, 0)),              # BN scale
            pl.BlockSpec((1, Cin), lambda n, r: (0, 0)),              # BN shift
            pl.BlockSpec((9 * Cin, Cout), lambda n, r: (0, 0)),       # im2col weights
            pl.BlockSpec((1, Cout), lambda n, r: (0, 0)),             # bias
        ],
        out_specs=(
            pl.BlockSpec((1, Ls, Cout), lambda n, r: (n, r, 0)),      # output strip
            pl.BlockSpec((1, 1, 1, Cout), lambda n, r: (n, r, 0, 0)),  # per-strip sum
            pl.BlockSpec((1, 1, 1, Cout), lambda n, r: (n, r, 0, 0)),  # per-strip sum-sq
        ),
        scratch_shapes=[
            pltpu.VMEM((n_in * pitch, Cin), COMPUTE_DTYPE),           # padded BN+ReLU slab
            pltpu.VMEM((Ls, 9 * Cin), COMPUTE_DTYPE),                 # im2col slab
        ],
        compiler_params=pltpu.CompilerParams(
            # Strip axis stays "arbitrary": the r==0 slab clear relies on in-order
            # strips per image.  TODO(synk): per-step pad clears would let it be
            # "parallel" to use both v7x TensorCores when N is small.
            dimension_semantics=("parallel", "arbitrary"),
            vmem_limit_bytes=vmem_limit),
    )(x_flat, scale, shift, w_mat, bias)

    cnt = N * H_out * W_out
    mean_y = jnp.sum(s1, axis=(0, 1, 2)) / cnt
    var_y = jnp.maximum(jnp.sum(s2, axis=(0, 1, 2)) / cnt - mean_y * mean_y, 0.0)
    return y, H_out, W_out, (mean_y, var_y)


# ---------------------------------------------------------------------------
# PlainBlock / ResNetStage forward (Pallas)
# ---------------------------------------------------------------------------
def plain_block_fwd(x_flat, H, W, p, stats, last=False):
    x_flat, H, W, stats = bn_relu_conv(x_flat, H, W, p["gamma1"], p["beta1"],
                                       p["w1"], p["b1"], stride=1, stats=stats)
    s2 = 2 if p["downsample"] else 1
    out_dt = jnp.float32 if last else COMPUTE_DTYPE      # bf16 inter-layer activations
    x_flat, H, W, stats = bn_relu_conv(x_flat, H, W, p["gamma2"], p["beta2"],
                                       p["w2"], p["b2"], stride=s2, stats=stats,
                                       out_dtype=out_dt)
    return x_flat, H, W, stats


def resnet_stage_fwd(x_nchw, blocks):
    N, C, H, W = x_nchw.shape
    x = jnp.transpose(x_nchw, (0, 2, 3, 1)).reshape(N, H * W, C)     # NCHW -> flat NHWC
    stats = None                                                     # first BN: stats kernel
    for bi, p in enumerate(blocks):
        x, H, W, stats = plain_block_fwd(x, H, W, p, stats, last=(bi == len(blocks) - 1))
    Cf = x.shape[-1]
    return jnp.transpose(x.reshape(N, H, W, Cf), (0, 3, 1, 2))       # -> NCHW (f32)


# ---------------------------------------------------------------------------
# Pure-JAX references (f32 "module" math, and bf16-matched math for tight check)
# ---------------------------------------------------------------------------
def _ref_bn_relu_conv(x, gamma, beta, w, b, stride, cast_bf16):
    mean = jnp.mean(x, axis=(0, 1, 2))
    var = jnp.mean((x - mean) ** 2, axis=(0, 1, 2))
    xn = jnp.maximum((x - mean) / jnp.sqrt(var + EPS) * gamma + beta, 0.0)
    lhs, rhs = xn, w
    kwargs = {"precision": lax.Precision.HIGHEST}
    if cast_bf16:
        lhs, rhs = xn.astype(jnp.bfloat16), w.astype(jnp.bfloat16)
        kwargs = {}
    out = lax.conv_general_dilated(
        lhs, rhs, window_strides=(stride, stride), padding=((1, 1), (1, 1)),
        dimension_numbers=("NHWC", "HWIO", "NHWC"),
        preferred_element_type=jnp.float32, **kwargs)
    return out + b


def resnet_stage_ref(x_nchw, blocks, cast_bf16=False):
    x = jnp.transpose(x_nchw, (0, 2, 3, 1))
    layers = []
    for p in blocks:
        layers.append((p["gamma1"], p["beta1"], p["w1"], p["b1"], 1))
        layers.append((p["gamma2"], p["beta2"], p["w2"], p["b2"],
                       2 if p["downsample"] else 1))
    for idx, (g, bt, w, bi, s) in enumerate(layers):
        x = _ref_bn_relu_conv(x, g, bt, w, bi, s, cast_bf16)
        if cast_bf16 and idx != len(layers) - 1:
            x = x.astype(jnp.bfloat16).astype(jnp.float32)   # mirror bf16 inter-layer acts
    return jnp.transpose(x, (0, 3, 1, 2))


# ---------------------------------------------------------------------------
# Deterministic parameter init (shapes match the PyTorch module __init__)
# ---------------------------------------------------------------------------
def init_resnet_stage(key, Cin, Cout, num_blocks, downsample=True):
    blocks = []
    cins = [Cin] + [Cout] * (num_blocks - 1)
    downs = [downsample] + [False] * (num_blocks - 1)
    for ci, dn in zip(cins, downs):
        key, *ks = jax.random.split(key, 9)
        blocks.append({
            "gamma1": 1.0 + 0.1 * jax.random.normal(ks[0], (ci,), jnp.float32),
            "beta1": 0.1 * jax.random.normal(ks[1], (ci,), jnp.float32),
            "w1": 0.2 * jax.random.normal(ks[2], (3, 3, ci, Cout), jnp.float32),
            "b1": 0.1 * jax.random.normal(ks[3], (Cout,), jnp.float32),
            "gamma2": 1.0 + 0.1 * jax.random.normal(ks[4], (Cout,), jnp.float32),
            "beta2": 0.1 * jax.random.normal(ks[5], (Cout,), jnp.float32),
            "w2": 0.2 * jax.random.normal(ks[6], (3, 3, Cout, Cout), jnp.float32),
            "b2": 0.1 * jax.random.normal(ks[7], (Cout,), jnp.float32),
            "downsample": dn,
        })
    return blocks


if __name__ == "__main__":
    key = jax.random.PRNGKey(0)
    kx, kp = jax.random.split(key)

    N, Cin, H, W = 2, 4, 16, 16
    Cout, num_blocks = 8, 2

    x = jax.random.normal(kx, (N, Cin, H, W), dtype=jnp.float32)   # NCHW, like PyTorch
    params = init_resnet_stage(kp, Cin, Cout, num_blocks, downsample=True)

    out = jax.block_until_ready(resnet_stage_fwd(x, params))

    ref_bf16 = resnet_stage_ref(x, params, cast_bf16=True)    # bf16-matched numerics
    ref_f32 = resnet_stage_ref(x, params, cast_bf16=False)    # true f32 module math

    assert out.shape == (N, Cout, H // 2, W // 2), out.shape
    err_tight = float(jnp.max(jnp.abs(out - ref_bf16)))
    assert jnp.allclose(out, ref_bf16, atol=2e-2, rtol=2e-2), err_tight
    err_loose = float(jnp.max(jnp.abs(out - ref_f32)))
    assert jnp.allclose(out, ref_f32, atol=1e-1, rtol=5e-2), err_loose

    print("KERNEL_OK")
</pallas_src>

<mosaic_0001>
module attributes {stable_mosaic.version = 11 : i64} {
  func.func @_bn_stats_kernel(%arg0: i32, %arg1: memref<512x4xf32, #tpu.memory_space<vmem>>, %arg2: memref<1x4xf32, #tpu.memory_space<vmem>>, %arg3: memref<1x4xf32, #tpu.memory_space<vmem>>) attributes {dimension_semantics = [#tpu.dimension_semantics<arbitrary>], iteration_bounds = array<i64: 1>, scalar_prefetch = 0 : i64, scratch_operands = 0 : i64, tpu.core_type = #tpu.core_type<tc>, window_params = [{transform_indices = @transform_0, window_bounds = array<i64: 512, 4>}, {pipeline_mode = #tpu.pipeline_mode<synchronous>, transform_indices = @transform_1, window_bounds = array<i64: 1, 4>}, {pipeline_mode = #tpu.pipeline_mode<synchronous>, transform_indices = @transform_2, window_bounds = array<i64: 1, 4>}]} {
    %c0_i32 = arith.constant 0 : i32
    %0 = arith.cmpi eq, %arg0, %c0_i32 : i32
    %1 = arith.extui %0 : i1 to i32
    %c0_i32_0 = arith.constant 0 : i32
    %2 = arith.cmpi ne, %1, %c0_i32_0 : i32
    scf.if %2 {
      %cst_11 = arith.constant 0.000000e+00 : f32
      %15 = vector.broadcast %cst_11 : f32 to vector<1x4xf32>
      %c0_12 = arith.constant 0 : index
      %c0_13 = arith.constant 0 : index
      %16 = vector.load %arg2[%c0_12, %c0_13] : memref<1x4xf32, #tpu.memory_space<vmem>>, vector<1x4xf32>
      tpu.vector_store %arg2[%c0_12, %c0_13], %15 {strides = array<i32>} : memref<1x4xf32, #tpu.memory_space<vmem>>, vector<1x4xf32>,
      %cst_14 = arith.constant 0.000000e+00 : f32
      %17 = vector.broadcast %cst_14 : f32 to vector<1x4xf32>
      %c0_15 = arith.constant 0 : index
      %c0_16 = arith.constant 0 : index
      %18 = vector.load %arg3[%c0_15, %c0_16] : memref<1x4xf32, #tpu.memory_space<vmem>>, vector<1x4xf32>
      tpu.vector_store %arg3[%c0_15, %c0_16], %17 {strides = array<i32>} : memref<1x4xf32, #tpu.memory_space<vmem>>, vector<1x4xf32>,
    } else {
    }
    %c0 = arith.constant 0 : index
    %c0_1 = arith.constant 0 : index
    %3 = vector.load %arg1[%c0, %c0_1] : memref<512x4xf32, #tpu.memory_space<vmem>>, vector<512x4xf32>
    %c0_2 = arith.constant 0 : index
    %c0_3 = arith.constant 0 : index
    %4 = vector.load %arg2[%c0_2, %c0_3] : memref<1x4xf32, #tpu.memory_space<vmem>>, vector<1x4xf32>
    %cst = arith.constant dense<0.000000e+00> : vector<4xf32>
    %5 = vector.multi_reduction <add>, %3, %cst [0] : vector<512x4xf32> to vector<4xf32>
    %6 = vector.shape_cast %5 : vector<4xf32> to vector<1x4xf32>
    %7 = arith.addf %4, %6 : vector<1x4xf32>
    %c0_4 = arith.constant 0 : index
    %c0_5 = arith.constant 0 : index
    %8 = vector.load %arg2[%c0_4, %c0_5] : memref<1x4xf32, #tpu.memory_space<vmem>>, vector<1x4xf32>
    tpu.vector_store %arg2[%c0_4, %c0_5], %7 {strides = array<i32>} : memref<1x4xf32, #tpu.memory_space<vmem>>, vector<1x4xf32>,
    %c0_6 = arith.constant 0 : index
    %c0_7 = arith.constant 0 : index
    %9 = vector.load %arg3[%c0_6, %c0_7] : memref<1x4xf32, #tpu.memory_space<vmem>>, vector<1x4xf32>
    %10 = arith.mulf %3, %3 : vector<512x4xf32>
    %cst_8 = arith.constant dense<0.000000e+00> : vector<4xf32>
    %11 = vector.multi_reduction <add>, %10, %cst_8 [0] : vector<512x4xf32> to vector<4xf32>
    %12 = vector.shape_cast %11 : vector<4xf32> to vector<1x4xf32>
    %13 = arith.addf %9, %12 : vector<1x4xf32>
    %c0_9 = arith.constant 0 : index
    %c0_10 = arith.constant 0 : index
    %14 = vector.load %arg3[%c0_9, %c0_10] : memref<1x4xf32, #tpu.memory_space<vmem>>, vector<1x4xf32>
    tpu.vector_store %arg3[%c0_9, %c0_10], %13 {strides = array<i32>} : memref<1x4xf32, #tpu.memory_space<vmem>>, vector<1x4xf32>,
    return
  }
  func.func @transform_0(%arg0: i32) -> (i32, i32) {
    %c0_i32 = arith.constant 0 : i32
    %c0_i32_0 = arith.constant 0 : i32
    return %arg0, %c0_i32 : i32, i32
  }
  func.func @transform_1(%arg0: i32) -> (i32, i32) {
    %c0_i32 = arith.constant 0 : i32
    %c0_i32_0 = arith.constant 0 : i32
    %c0_i32_1 = arith.constant 0 : i32
    return %c0_i32, %c0_i32_0 : i32, i32
  }
  func.func @transform_2(%arg0: i32) -> (i32, i32) {
    %c0_i32 = arith.constant 0 : i32
    %c0_i32_0 = arith.constant 0 : i32
    %c0_i32_1 = arith.constant 0 : i32
    return %c0_i32, %c0_i32_0 : i32, i32
  }
}

</mosaic_0001>

<bundles_post_ra>
// kernel: tpu_custom_call.1
= control target key start
LH: loop header
LB: loop body
LE: loop exit
PB: predicated region body
PF: predicated region fallthrough
CT: control target
= control target key end

     0   :  { %8 = vsyncpa [#allocation3], 0  ;;  %s1156_s0 = inlined_call_operand.vmem [shape: f32[512,4], index: 0, kind: input, shape index: {}]   ;;  %s1157_s1 = inlined_call_operand.hbm [shape: f32[1,4], index: 1, kind: output, shape index: {0}]   ;;  %s1158_s2 = inlined_call_operand.hbm [shape: f32[1,4], index: 2, kind: output, shape index: {1}]  }
   0x1   :  { %9 = vsyncpa [#allocation5], 0  ;;  %vm16_vm0 = vcmask 24576   ;;  %v500_v0 = vmov 0.0   ;;  %v19_v1 = vld [vmem:[%s1156_s0] sm:$0xff]  ;;  %v20_v2 = vld [vmem:[%s1156_s0 + $0x8] sm:$0xff] }
   0x2   :  { %17 = vst.msk [vmem:[#allocation2] sm:$0x1] %vm16_vm0, %v500_v0  ;;  %18 = vst.msk [vmem:[#allocation4] sm:$0x1] %vm16_vm0, %v500_v0  ;;  %v21_v3 = vld [vmem:[%s1156_s0 + $0x10] sm:$0xff]  ;;  %vm84_vm1 = vcmask 31744   ;;  %v222_v55 = vmul.f32 %v19_v1, %v19_v1  ;;  %v223_v56 = vmul.f32 %v20_v2, %v20_v2 }
   0x3   :  { %v85_v4 = vsel %vm84_vm1, %v19_v1, 0.0  ;;  %v86_v5 = vsel %vm84_vm1, %v20_v2, 0.0  ;;  %v88_v6 = vsel %vm84_vm1, %v21_v3, 0.0  ;;  %v22_v7 = vld [vmem:[%s1156_s0 + $0x18] sm:$0xff]  ;;  %v23_v10 = vld [vmem:[%s1156_s0 + $0x20] sm:$0xff]  ;;  %v24_v13 = vld [vmem:[%s1156_s0 + $0x28] sm:$0xff]  ;;  %v224_v57 = vmul.f32 %v21_v3, %v21_v3 }
   0x4   :  { %v87_v8 = vadd.f32 %v86_v5, %v85_v4  ;;  %v90_v9 = vsel %vm84_vm1, %v22_v7, 0.0  ;;  %v92_v12 = vsel %vm84_vm1, %v23_v10, 0.0  ;;  %v94_v15 = vsel %vm84_vm1, %v24_v13, 0.0  ;;  %v547_v16 = vld [vmem:[%s1156_s0 + $0x30] sm:$0xff]  ;;  %v554_v19 = vld [vmem:[%s1156_s0 + $0x38] sm:$0xff]  ;;  %v561_v22 = vld [vmem:[%s1156_s0 + $0x40] sm:$0xff] }
   0x5   :  { %v96_v18 = vsel %vm84_vm1, %v547_v16, 0.0  ;;  %v98_v21 = vsel %vm84_vm1, %v554_v19, 0.0  ;;  %v100_v24 = vsel %vm84_vm1, %v561_v22, 0.0  ;;  %v568_v25 = vld [vmem:[%s1156_s0 + $0x48] sm:$0xff]  ;;  %v575_v28 = vld [vmem:[%s1156_s0 + $0x50] sm:$0xff]  ;;  %v582_v31 = vld [vmem:[%s1156_s0 + $0x58] sm:$0xff]  ;;  %v225_v61 = vmul.f32 %v22_v7, %v22_v7 }
   0x6   :  { %v89_v11 = vadd.f32 %v88_v6, %v87_v8  ;;  %v102_v27 = vsel %vm84_vm1, %v568_v25, 0.0  ;;  %v104_v30 = vsel %vm84_vm1, %v575_v28, 0.0  ;;  %v106_v33 = vsel %vm84_vm1, %v582_v31, 0.0  ;;  %v589_v34 = vld [vmem:[%s1156_s0 + $0x60] sm:$0xff]  ;;  %v596_v37 = vld [vmem:[%s1156_s0 + $0x68] sm:$0xff]  ;;  %v603_v40 = vld [vmem:[%s1156_s0 + $0x70] sm:$0xff] }
   0x7   :  { %v108_v36 = vsel %vm84_vm1, %v589_v34, 0.0  ;;  %v110_v39 = vsel %vm84_vm1, %v596_v37, 0.0  ;;  %v112_v42 = vsel %vm84_vm1, %v603_v40, 0.0  ;;  %v610_v43 = vld [vmem:[%s1156_s0 + $0x78] sm:$0xff]  ;;  %v617_v46 = vld [vmem:[%s1156_s0 + $0x80] sm:$0xff]  ;;  %v624_v49 = vld [vmem:[%s1156_s0 + $0x88] sm:$0xff]  ;;  %v226_v0 = vmul.f32 %v23_v10, %v23_v10 }
   0x8   :  { %v91_v14 = vadd.f32 %v90_v9, %v89_v11  ;;  %v114_v45 = vsel %vm84_vm1, %v610_v43, 0.0  ;;  %v116_v48 = vsel %vm84_vm1, %v617_v46, 0.0  ;;  %v118_v51 = vsel %vm84_vm1, %v624_v49, 0.0  ;;  %v631_v52 = vld [vmem:[%s1156_s0 + $0x90] sm:$0xff]  ;;  %v638_v58 = vld [vmem:[%s1156_s0 + $0x98] sm:$0xff]  ;;  %v645_v62 = vld [vmem:[%s1156_s0 + $0xa0] sm:$0xff] }
   0x9   :  { %v120_v54 = vsel %vm84_vm1, %v631_v52, 0.0  ;;  %v122_v60 = vsel %vm84_vm1, %v638_v58, 0.0  ;;  %v124_v1 = vsel %vm84_vm1, %v645_v62, 0.0  ;;  %v286_v2 = vsel %vm84_vm1, %v222_v55, 0.0  ;;  %v655_v5 = vld [vmem:[%s1156_s0 + $0xa8] sm:$0xff]  ;;  %v663_v11 = vld [vmem:[%s1156_s0 + $0xb0] sm:$0xff] }
   0xa   :  { %v93_v17 = vadd.f32 %v92_v12, %v91_v14  ;;  %v287_v3 = vsel %vm84_vm1, %v223_v56, 0.0  ;;  %v289_v4 = vsel %vm84_vm1, %v224_v57, 0.0  ;;  %v126_v8 = vsel %vm84_vm1, %v655_v5, 0.0 }
   0xb   :  { %v288_v7 = vadd.f32 %v287_v3, %v286_v2  ;;  %v227_v9 = vmul.f32 %v24_v13, %v24_v13  ;;  %v291_v10 = vsel %vm84_vm1, %v225_v61, 0.0  ;;  %v673_v13 = vld [vmem:[%s1156_s0 + $0xb8] sm:$0xff]  ;;  %v235_v2 = vmul.f32 %v596_v37, %v596_v37 }
   0xc   :  { %v95_v20 = vadd.f32 %v94_v15, %v93_v17  ;;  %v128_v15 = vsel %vm84_vm1, %v663_v11, 0.0  ;;  %v228_v17 = vmul.f32 %v547_v16, %v547_v16  ;;  %v683_v16 = vld [vmem:[%s1156_s0 + $0xc0] sm:$0xff]  ;;  %v753_v37 = vld [vmem:[%s1156_s0 + $0xf8] sm:$0xff] }
   0xd   :  { %v290_v14 = vadd.f32 %v289_v4, %v288_v7 }
   0xe   :  { %v97_v23 = vadd.f32 %v96_v18, %v95_v20  ;;  %v293_v18 = vsel %vm84_vm1, %v226_v0, 0.0 }
  0x10   :  { %v99_v26 = vadd.f32 %v98_v21, %v97_v23  ;;  %v292_v21 = vadd.f32 %v291_v10, %v290_v14  ;;  %v130_v23 = vsel %vm84_vm1, %v673_v13, 0.0  ;;  %v146_v14 = vsel %vm84_vm1, %v753_v37, 0.0 }
  0x12   :  { %v101_v29 = vadd.f32 %v100_v24, %v99_v26  ;;  %v229_v24 = vmul.f32 %v554_v19, %v554_v19  ;;  %v295_v26 = vsel %vm84_vm1, %v227_v9, 0.0  ;;  %v693_v19 = vld [vmem:[%s1156_s0 + $0xc8] sm:$0xff] }
  0x14   :  { %v103_v32 = vadd.f32 %v102_v27, %v101_v29  ;;  %v294_v29 = vadd.f32 %v293_v18, %v292_v21 }
  0x16   :  { %v105_v35 = vadd.f32 %v104_v30, %v103_v32  ;;  %v132_v30 = vsel %vm84_vm1, %v683_v16, 0.0  ;;  %v230_v32 = vmul.f32 %v561_v22, %v561_v22  ;;  %v703_v22 = vld [vmem:[%s1156_s0 + $0xd0] sm:$0xff] }
  0x18   :  { %v107_v38 = vadd.f32 %v106_v33, %v105_v35  ;;  %v297_v33 = vsel %vm84_vm1, %v228_v17, 0.0  ;;  %v311_v17 = vsel %vm84_vm1, %v235_v2, 0.0 }
  0x1a   :  { %v109_v41 = vadd.f32 %v108_v36, %v107_v38  ;;  %v296_v36 = vadd.f32 %v295_v26, %v294_v29  ;;  %v134_v38 = vsel %vm84_vm1, %v693_v19, 0.0 }
  0x1c   :  { %v111_v44 = vadd.f32 %v110_v39, %v109_v41  ;;  %v231_v39 = vmul.f32 %v568_v25, %v568_v25  ;;  %v299_v41 = vsel %vm84_vm1, %v229_v24, 0.0  ;;  %v713_v25 = vld [vmem:[%s1156_s0 + $0xd8] sm:$0xff] }
  0x1e   :  { %v113_v47 = vadd.f32 %v112_v42, %v111_v44  ;;  %v298_v44 = vadd.f32 %v297_v33, %v296_v36  ;;  %v303_v55 = vsel %vm84_vm1, %v231_v39, 0.0 }
  0x20   :  { %v115_v50 = vadd.f32 %v114_v45, %v113_v47  ;;  %v136_v45 = vsel %vm84_vm1, %v703_v22, 0.0  ;;  %v232_v47 = vmul.f32 %v575_v28, %v575_v28  ;;  %v723_v28 = vld [vmem:[%s1156_s0 + $0xe0] sm:$0xff] }
  0x22   :  { %v117_v53 = vadd.f32 %v116_v48, %v115_v50  ;;  %v301_v48 = vsel %vm84_vm1, %v230_v32, 0.0  ;;  %v305_v61 = vsel %vm84_vm1, %v232_v47, 0.0 }
  0x24   :  { %v119_v59 = vadd.f32 %v118_v51, %v117_v53  ;;  %v300_v51 = vadd.f32 %v299_v41, %v298_v44  ;;  %v138_v53 = vsel %vm84_vm1, %v713_v25, 0.0 }
  0x26   :  { %v121_v63 = vadd.f32 %v120_v54, %v119_v59  ;;  %v233_v54 = vmul.f32 %v582_v31, %v582_v31  ;;  %v302_v57 = vadd.f32 %v301_v48, %v300_v51  ;;  %v140_v59 = vsel %vm84_vm1, %v723_v28, 0.0  ;;  %v733_v31 = vld [vmem:[%s1156_s0 + $0xe8] sm:$0xff] }
  0x28   :  { %v123_v6 = vadd.f32 %v122_v60, %v121_v63  ;;  %v234_v60 = vmul.f32 %v589_v34, %v589_v34  ;;  %v304_v0 = vadd.f32 %v303_v55, %v302_v57  ;;  %v307_v3 = vsel %vm84_vm1, %v233_v54, 0.0  ;;  %v743_v34 = vld [vmem:[%s1156_s0 + $0xf0] sm:$0xff] }
  0x29   :  { %v144_v7 = vsel %vm84_vm1, %v743_v34, 0.0 }
  0x2a   :  { %v125_v12 = vadd.f32 %v124_v1, %v123_v6  ;;  %v142_v1 = vsel %vm84_vm1, %v733_v31, 0.0  ;;  %v306_v6 = vadd.f32 %v305_v61, %v304_v0  ;;  %v309_v9 = vsel %vm84_vm1, %v234_v60, 0.0 }
  0x2c   :  { %v127_v20 = vadd.f32 %v126_v8, %v125_v12  ;;  %v236_v8 = vmul.f32 %v603_v40, %v603_v40  ;;  %v308_v12 = vadd.f32 %v307_v3, %v306_v6  ;;  %v763_v40 = vld [vmem:[%s1156_s0 + $0x100] sm:$0xff] }
  0x2d   :  { %v148_v21 = vsel %vm84_vm1, %v763_v40, 0.0 }
  0x2e   :  { %v129_v27 = vadd.f32 %v128_v15, %v127_v20  ;;  %v237_v15 = vmul.f32 %v610_v43, %v610_v43  ;;  %v310_v20 = vadd.f32 %v309_v9, %v308_v12  ;;  %v313_v24 = vsel %vm84_vm1, %v236_v8, 0.0  ;;  %v773_v43 = vld [vmem:[%s1156_s0 + $0x108] sm:$0xff] }
  0x2f   :  { %v150_v29 = vsel %vm84_vm1, %v773_v43, 0.0 }
  0x30   :  { %v131_v35 = vadd.f32 %v130_v23, %v129_v27  ;;  %v238_v23 = vmul.f32 %v617_v46, %v617_v46  ;;  %v312_v27 = vadd.f32 %v311_v17, %v310_v20  ;;  %v315_v32 = vsel %vm84_vm1, %v237_v15, 0.0  ;;  %v783_v46 = vld [vmem:[%s1156_s0 + $0x110] sm:$0xff] }
  0x31   :  { %v152_v36 = vsel %vm84_vm1, %v783_v46, 0.0 }
  0x32   :  { %v133_v42 = vadd.f32 %v132_v30, %v131_v35  ;;  %v239_v30 = vmul.f32 %v624_v49, %v624_v49  ;;  %v314_v35 = vadd.f32 %v313_v24, %v312_v27  ;;  %v317_v39 = vsel %vm84_vm1, %v238_v23, 0.0  ;;  %v793_v49 = vld [vmem:[%s1156_s0 + $0x118] sm:$0xff] }
  0x33   :  { %v154_v44 = vsel %vm84_vm1, %v793_v49, 0.0 }
  0x34   :  { %v135_v50 = vadd.f32 %v134_v38, %v133_v42  ;;  %v240_v38 = vmul.f32 %v631_v52, %v631_v52  ;;  %v316_v42 = vadd.f32 %v315_v32, %v314_v35  ;;  %v319_v47 = vsel %vm84_vm1, %v239_v30, 0.0  ;;  %v803_v52 = vld [vmem:[%s1156_s0 + $0x120] sm:$0xff] }
  0x35   :  { %v156_v51 = vsel %vm84_vm1, %v803_v52, 0.0 }
  0x36   :  { %v137_v56 = vadd.f32 %v136_v45, %v135_v50  ;;  %v241_v45 = vmul.f32 %v638_v58, %v638_v58  ;;  %v318_v50 = vadd.f32 %v317_v39, %v316_v42  ;;  %v321_v54 = vsel %vm84_vm1, %v240_v38, 0.0  ;;  %v813_v58 = vld [vmem:[%s1156_s0 + $0x128] sm:$0xff] }
  0x37   :  { %v158_v57 = vsel %vm84_vm1, %v813_v58, 0.0 }
  0x38   :  { %v139_v63 = vadd.f32 %v138_v53, %v137_v56  ;;  %v242_v53 = vmul.f32 %v645_v62, %v645_v62  ;;  %v320_v56 = vadd.f32 %v319_v47, %v318_v50  ;;  %v323_v60 = vsel %vm84_vm1, %v241_v45, 0.0  ;;  %v823_v62 = vld [vmem:[%s1156_s0 + $0x130] sm:$0xff] }
  0x39   :  { %v160_v0 = vsel %vm84_vm1, %v823_v62, 0.0 }
  0x3a   :  { %v141_v4 = vadd.f32 %v140_v59, %v139_v63  ;;  %v243_v59 = vmul.f32 %v655_v5, %v655_v5  ;;  %v322_v63 = vadd.f32 %v321_v54, %v320_v56  ;;  %v325_v2 = vsel %vm84_vm1, %v242_v53, 0.0  ;;  %v833_v5 = vld [vmem:[%s1156_s0 + $0x138] sm:$0xff] }
  0x3b   :  { %v162_v6 = vsel %vm84_vm1, %v833_v5, 0.0 }
  0x3c   :  { %v143_v10 = vadd.f32 %v142_v1, %v141_v4  ;;  %v244_v1 = vmul.f32 %v663_v11, %v663_v11  ;;  %v324_v4 = vadd.f32 %v323_v60, %v322_v63  ;;  %v327_v8 = vsel %vm84_vm1, %v243_v59, 0.0  ;;  %v843_v11 = vld [vmem:[%s1156_s0 + $0x140] sm:$0xff] }
  0x3d   :  { %v164_v12 = vsel %vm84_vm1, %v843_v11, 0.0 }
  0x3e   :  { %v145_v18 = vadd.f32 %v144_v7, %v143_v10  ;;  %v245_v7 = vmul.f32 %v673_v13, %v673_v13  ;;  %v326_v10 = vadd.f32 %v325_v2, %v324_v4  ;;  %v329_v15 = vsel %vm84_vm1, %v244_v1, 0.0  ;;  %v853_v13 = vld [vmem:[%s1156_s0 + $0x148] sm:$0xff] }
  0x3f   :  { %v166_v20 = vsel %vm84_vm1, %v853_v13, 0.0 }
  0x40   :  { %v147_v26 = vadd.f32 %v146_v14, %v145_v18  ;;  %v246_v14 = vmul.f32 %v683_v16, %v683_v16  ;;  %v328_v18 = vadd.f32 %v327_v8, %v326_v10  ;;  %v331_v23 = vsel %vm84_vm1, %v245_v7, 0.0  ;;  %v863_v16 = vld [vmem:[%s1156_s0 + $0x150] sm:$0xff] }
  0x41   :  { %v168_v27 = vsel %vm84_vm1, %v863_v16, 0.0 }
  0x42   :  { %v149_v33 = vadd.f32 %v148_v21, %v147_v26  ;;  %v247_v21 = vmul.f32 %v693_v19, %v693_v19  ;;  %v330_v26 = vadd.f32 %v329_v15, %v328_v18  ;;  %v333_v30 = vsel %vm84_vm1, %v246_v14, 0.0  ;;  %v873_v19 = vld [vmem:[%s1156_s0 + $0x158] sm:$0xff] }
  0x43   :  { %v170_v35 = vsel %vm84_vm1, %v873_v19, 0.0 }
  0x44   :  { %v151_v41 = vadd.f32 %v150_v29, %v149_v33  ;;  %v248_v29 = vmul.f32 %v703_v22, %v703_v22  ;;  %v332_v33 = vadd.f32 %v331_v23, %v330_v26  ;;  %v335_v38 = vsel %vm84_vm1, %v247_v21, 0.0  ;;  %v883_v22 = vld [vmem:[%s1156_s0 + $0x160] sm:$0xff] }
  0x45   :  { %v172_v42 = vsel %vm84_vm1, %v883_v22, 0.0 }
  0x46   :  { %v153_v48 = vadd.f32 %v152_v36, %v151_v41  ;;  %v249_v36 = vmul.f32 %v713_v25, %v713_v25  ;;  %v334_v41 = vadd.f32 %v333_v30, %v332_v33  ;;  %v337_v45 = vsel %vm84_vm1, %v248_v29, 0.0  ;;  %v893_v25 = vld [vmem:[%s1156_s0 + $0x168] sm:$0xff] }
  0x47   :  { %v174_v50 = vsel %vm84_vm1, %v893_v25, 0.0 }
  0x48   :  { %v155_v55 = vadd.f32 %v154_v44, %v153_v48  ;;  %v250_v44 = vmul.f32 %v723_v28, %v723_v28  ;;  %v336_v48 = vadd.f32 %v335_v38, %v334_v41  ;;  %v339_v53 = vsel %vm84_vm1, %v249_v36, 0.0  ;;  %v903_v28 = vld [vmem:[%s1156_s0 + $0x170] sm:$0xff] }
  0x49   :  { %v176_v56 = vsel %vm84_vm1, %v903_v28, 0.0 }
  0x4a   :  { %v157_v61 = vadd.f32 %v156_v51, %v155_v55  ;;  %v251_v51 = vmul.f32 %v733_v31, %v733_v31  ;;  %v338_v55 = vadd.f32 %v337_v45, %v336_v48  ;;  %v341_v59 = vsel %vm84_vm1, %v250_v44, 0.0  ;;  %v913_v31 = vld [vmem:[%s1156_s0 + $0x178] sm:$0xff] }
  0x4b   :  { %v178_v63 = vsel %vm84_vm1, %v913_v31, 0.0 }
  0x4c   :  { %v159_v3 = vadd.f32 %v158_v57, %v157_v61  ;;  %v252_v57 = vmul.f32 %v743_v34, %v743_v34  ;;  %v340_v61 = vadd.f32 %v339_v53, %v338_v55  ;;  %v343_v1 = vsel %vm84_vm1, %v251_v51, 0.0  ;;  %v923_v34 = vld [vmem:[%s1156_s0 + $0x180] sm:$0xff] }
  0x4d   :  { %v180_v4 = vsel %vm84_vm1, %v923_v34, 0.0 }
  0x4e   :  { %v161_v9 = vadd.f32 %v160_v0, %v159_v3  ;;  %v253_v0 = vmul.f32 %v753_v37, %v753_v37  ;;  %v342_v3 = vadd.f32 %v341_v59, %v340_v61  ;;  %v345_v7 = vsel %vm84_vm1, %v252_v57, 0.0  ;;  %v933_v37 = vld [vmem:[%s1156_s0 + $0x188] sm:$0xff] }
  0x4f   :  { %v182_v10 = vsel %vm84_vm1, %v933_v37, 0.0 }
  0x50   :  { %v163_v17 = vadd.f32 %v162_v6, %v161_v9  ;;  %v254_v6 = vmul.f32 %v763_v40, %v763_v40  ;;  %v344_v9 = vadd.f32 %v343_v1, %v342_v3  ;;  %v347_v14 = vsel %vm84_vm1, %v253_v0, 0.0  ;;  %v943_v40 = vld [vmem:[%s1156_s0 + $0x190] sm:$0xff] }
  0x51   :  { %v184_v18 = vsel %vm84_vm1, %v943_v40, 0.0 }
  0x52   :  { %v165_v24 = vadd.f32 %v164_v12, %v163_v17  ;;  %v255_v12 = vmul.f32 %v773_v43, %v773_v43  ;;  %v346_v17 = vadd.f32 %v345_v7, %v344_v9  ;;  %v349_v21 = vsel %vm84_vm1, %v254_v6, 0.0  ;;  %v953_v43 = vld [vmem:[%s1156_s0 + $0x198] sm:$0xff] }
  0x53   :  { %v186_v26 = vsel %vm84_vm1, %v953_v43, 0.0 }
  0x54   :  { %v167_v32 = vadd.f32 %v166_v20, %v165_v24  ;;  %v256_v20 = vmul.f32 %v783_v46, %v783_v46  ;;  %v348_v24 = vadd.f32 %v347_v14, %v346_v17  ;;  %v351_v29 = vsel %vm84_vm1, %v255_v12, 0.0  ;;  %v963_v46 = vld [vmem:[%s1156_s0 + $0x1a0] sm:$0xff] }
  0x55   :  { %v188_v33 = vsel %vm84_vm1, %v963_v46, 0.0 }
  0x56   :  { %v169_v39 = vadd.f32 %v168_v27, %v167_v32  ;;  %v257_v27 = vmul.f32 %v793_v49, %v793_v49  ;;  %v350_v32 = vadd.f32 %v349_v21, %v348_v24  ;;  %v353_v36 = vsel %vm84_vm1, %v256_v20, 0.0  ;;  %v973_v49 = vld [vmem:[%s1156_s0 + $0x1a8] sm:$0xff] }
  0x57   :  { %v190_v41 = vsel %vm84_vm1, %v973_v49, 0.0 }
  0x58   :  { %v171_v47 = vadd.f32 %v170_v35, %v169_v39  ;;  %v258_v35 = vmul.f32 %v803_v52, %v803_v52  ;;  %v352_v39 = vadd.f32 %v351_v29, %v350_v32  ;;  %v355_v44 = vsel %vm84_vm1, %v257_v27, 0.0  ;;  %v983_v52 = vld [vmem:[%s1156_s0 + $0x1b0] sm:$0xff] }
  0x59   :  { %v192_v48 = vsel %vm84_vm1, %v983_v52, 0.0 }
  0x5a   :  { %v173_v54 = vadd.f32 %v172_v42, %v171_v47  ;;  %v259_v42 = vmul.f32 %v813_v58, %v813_v58  ;;  %v354_v47 = vadd.f32 %v353_v36, %v352_v39  ;;  %v357_v51 = vsel %vm84_vm1, %v258_v35, 0.0  ;;  %v993_v58 = vld [vmem:[%s1156_s0 + $0x1b8] sm:$0xff] }
  0x5b   :  { %v194_v55 = vsel %vm84_vm1, %v993_v58, 0.0 }
  0x5c   :  { %v175_v60 = vadd.f32 %v174_v50, %v173_v54  ;;  %v260_v50 = vmul.f32 %v823_v62, %v823_v62  ;;  %v356_v54 = vadd.f32 %v355_v44, %v354_v47  ;;  %v359_v57 = vsel %vm84_vm1, %v259_v42, 0.0  ;;  %v1003_v62 = vld [vmem:[%s1156_s0 + $0x1c0] sm:$0xff] }
  0x5d   :  { %v196_v61 = vsel %vm84_vm1, %v1003_v62, 0.0 }
  0x5e   :  { %v177_v2 = vadd.f32 %v176_v56, %v175_v60  ;;  %v261_v56 = vmul.f32 %v833_v5, %v833_v5  ;;  %v358_v60 = vadd.f32 %v357_v51, %v356_v54  ;;  %v361_v0 = vsel %vm84_vm1, %v260_v50, 0.0  ;;  %v1013_v5 = vld [vmem:[%s1156_s0 + $0x1c8] sm:$0xff] }
  0x5f   :  { %v198_v3 = vsel %vm84_vm1, %v1013_v5, 0.0 }
  0x60   :  { %v179_v8 = vadd.f32 %v178_v63, %v177_v2  ;;  %v262_v63 = vmul.f32 %v843_v11, %v843_v11  ;;  %v360_v2 = vadd.f32 %v359_v57, %v358_v60  ;;  %v363_v6 = vsel %vm84_vm1, %v261_v56, 0.0  ;;  %v1023_v11 = vld [vmem:[%s1156_s0 + $0x1d0] sm:$0xff] }
  0x61   :  { %v200_v9 = vsel %vm84_vm1, %v1023_v11, 0.0  ;;  %v271_v57 = vmul.f32 %v933_v37, %v933_v37  ;;  %v274_v37 = vmul.f32 %v963_v46, %v963_v46 }
  0x62   :  { %v181_v15 = vadd.f32 %v180_v4, %v179_v8  ;;  %v263_v4 = vmul.f32 %v853_v13, %v853_v13  ;;  %v362_v8 = vadd.f32 %v361_v0, %v360_v2  ;;  %v365_v12 = vsel %vm84_vm1, %v262_v63, 0.0  ;;  %v1033_v13 = vld [vmem:[%s1156_s0 + $0x1d8] sm:$0xff] }
  0x63   :  { %v202_v17 = vsel %vm84_vm1, %v1033_v13, 0.0  ;;  %v383_v2 = vsel %vm84_vm1, %v271_v57, 0.0 }
  0x64   :  { %v183_v23 = vadd.f32 %v182_v10, %v181_v15  ;;  %v264_v10 = vmul.f32 %v863_v16, %v863_v16  ;;  %v364_v15 = vadd.f32 %v363_v6, %v362_v8  ;;  %v367_v20 = vsel %vm84_vm1, %v263_v4, 0.0  ;;  %v1043_v16 = vld [vmem:[%s1156_s0 + $0x1e0] sm:$0xff] }
  0x65   :  { %v204_v24 = vsel %vm84_vm1, %v1043_v16, 0.0 }
  0x66   :  { %v185_v30 = vadd.f32 %v184_v18, %v183_v23  ;;  %v265_v18 = vmul.f32 %v873_v19, %v873_v19  ;;  %v366_v23 = vadd.f32 %v365_v12, %v364_v15  ;;  %v369_v27 = vsel %vm84_vm1, %v264_v10, 0.0  ;;  %v1053_v19 = vld [vmem:[%s1156_s0 + $0x1e8] sm:$0xff] }
  0x67   :  { %v206_v32 = vsel %vm84_vm1, %v1053_v19, 0.0  ;;  %v389_v15 = vsel %vm84_vm1, %v274_v37, 0.0 }
  0x68   :  { %v187_v38 = vadd.f32 %v186_v26, %v185_v30  ;;  %v266_v26 = vmul.f32 %v883_v22, %v883_v22  ;;  %v368_v30 = vadd.f32 %v367_v20, %v366_v23  ;;  %v371_v35 = vsel %vm84_vm1, %v265_v18, 0.0  ;;  %v1063_v22 = vld [vmem:[%s1156_s0 + $0x1f0] sm:$0xff] }
  0x69   :  { %v208_v39 = vsel %vm84_vm1, %v1063_v22, 0.0  ;;  %v277_v18 = vmul.f32 %v993_v58, %v993_v58  ;;  %v278_v23 = vmul.f32 %v1003_v62, %v1003_v62 }
  0x6a   :  { %v189_v45 = vadd.f32 %v188_v33, %v187_v38  ;;  %v267_v33 = vmul.f32 %v893_v25, %v893_v25  ;;  %v370_v38 = vadd.f32 %v369_v27, %v368_v30  ;;  %v373_v42 = vsel %vm84_vm1, %v266_v26, 0.0  ;;  %v1073_v25 = vld [vmem:[%s1156_s0 + $0x1f8] sm:$0xff]  ;;  %s501_s0 = smov [#allocation2]  }
  0x6b   :  { %v210_v47 = vsel %vm84_vm1, %v1073_v25, 0.0  ;;  %s427_s25 = sshll.u32 %s501_s0, 4  ;;  %v279_v26 = vmul.f32 %v1013_v5, %v1013_v5  ;;  %v395_v27 = vsel %vm84_vm1, %v277_v18, 0.0  ;;  %s428_s25 = int_to_ptr.vmem [resolvable:$true] %s427_s25 }
  0x6c   :  { %v191_v53 = vadd.f32 %v190_v41, %v189_v45  ;;  %v268_v41 = vmul.f32 %v903_v28, %v903_v28  ;;  %v372_v45 = vadd.f32 %v371_v35, %v370_v38  ;;  %v375_v50 = vsel %vm84_vm1, %v267_v33, 0.0  ;;  %s452_s26 = scalar_lea.vmem %s428_s25, 16  ;;  %s456_s27 = scalar_lea.vmem %s428_s25, 32 }
  0x6d   :  { %v270_v28 = vmul.f32 %v923_v34, %v923_v34  ;;  %v273_v34 = vmul.f32 %v953_v43, %v953_v43  ;;  %v276_v43 = vmul.f32 %v983_v52, %v983_v52  ;;  %p453_p0 = scmp.ne.s32.totalorder %s428_s25, %s452_s26  ;;  %p457_p1 = scmp.lt.s32.totalorder %s428_s25, %s428_s25 }
  0x6e   :  { %v193_v59 = vadd.f32 %v192_v48, %v191_v53  ;;  %v269_v48 = vmul.f32 %v913_v31, %v913_v31  ;;  %v374_v53 = vadd.f32 %v373_v42, %v372_v45  ;;  %v377_v54 = vsel %vm84_vm1, %v268_v41, 0.0  ;;  %p458_p2 = scmp.lt.s32.totalorder %s456_s27, %s452_s26 }
  0x6f   :  { %v272_v31 = vmul.f32 %v943_v40, %v943_v40  ;;  %v381_v63 = vsel %vm84_vm1, %v270_v28, 0.0  ;;  %v275_v40 = vmul.f32 %v973_v49, %v973_v49 }
  0x70   :  { %v195_v1 = vadd.f32 %v194_v55, %v193_v59  ;;  %v376_v56 = vadd.f32 %v375_v50, %v374_v53  ;;  %v379_v59 = vsel %vm84_vm1, %v269_v48, 0.0  ;;  %p459_p3 = por %p458_p2, %p457_p1 }
  0x71   :  { %v385_v6 = vsel %vm84_vm1, %v272_v31, 0.0  ;;  %v391_v20 = vsel %vm84_vm1, %v275_v40, 0.0 }
  0x72   :  { %v197_v7 = vadd.f32 %v196_v61, %v195_v1  ;;  %v378_v61 = vadd.f32 %v377_v54, %v376_v56  ;;  %p460_p4 = pnand %p459_p3, %p453_p0 }
  0x74   :  { %v199_v14 = vadd.f32 %v198_v3, %v197_v7  ;;  %v380_v1 = vadd.f32 %v379_v59, %v378_v61 }
  0x76   :  { %v201_v21 = vadd.f32 %v200_v9, %v199_v14  ;;  %v382_v4 = vadd.f32 %v381_v63, %v380_v1  ;;  %v387_v9 = vsel %vm84_vm1, %v273_v34, 0.0  ;;  %v83_v14 = vld [vmem:[#allocation2] sm:$0x1] }
  0x78   :  { %v203_v29 = vadd.f32 %v202_v17, %v201_v21  ;;  %v384_v8 = vadd.f32 %v383_v2, %v382_v4 }
  0x7a   :  { %v205_v36 = vadd.f32 %v204_v24, %v203_v29  ;;  %v386_v12 = vadd.f32 %v385_v6, %v384_v8  ;;  %v393_v24 = vsel %vm84_vm1, %v276_v43, 0.0 }
  0x7c   :  { %v207_v44 = vadd.f32 %v206_v32, %v205_v36  ;;  %v388_v17 = vadd.f32 %v387_v9, %v386_v12 }
  0x7e   :  { %v209_v51 = vadd.f32 %v208_v39, %v207_v44  ;;  %v390_v21 = vadd.f32 %v389_v15, %v388_v17 }
  0x80   :  { %v211_v55 = vadd.f32 %v210_v47, %v209_v51  ;;  %v392_v52 = vadd.f32 %v391_v20, %v390_v21 }
  0x82   :  { %v212_v60 = vrot.slane %v211_v55, 4 }
  0x84   :  { %v213_v0 = vadd.f32 %v212_v60, %v211_v55 }
  0x86   :  { %v214_v3 = vrot.slane %v213_v0, 2 }
  0x88   :  { %v215_v7 = vadd.f32 %v214_v3, %v213_v0 }
  0x8a   :  { %v216_v10 = vrot.slane %v215_v7, 1 }
  0x8c   :  { %v217_v46 = vadd.f32 %v216_v10, %v215_v7 }
  0x8e   :  { %v218_v49 = vadd.f32 %v217_v46, %v83_v14 }
  0x90   :  { %220 = vst.msk [vmem:[#allocation2] sm:$0x1] %vm16_vm0, %v218_v49 }
  0x91   :  { %463 = shalt.err (!%p460_p4)
}
  0x92   :  { %s464_s30 = scalar_lea.hbm %s1157_s1, 16 }
  0x93   :  { %p465_p5 = scmp.ne.s32.totalorder %s1157_s1, %s464_s30  ;;  %p468_p6 = scmp.lt.u32.totalorder %s464_s30, %s1157_s1 }
  0x95   :  { %p470_p7 = pnand %p468_p6, %p465_p5 }
  0x97   :  { %473 = shalt.err (!%p470_p7)
}
  0x98   :  { %430 = dma.vmem_to_hbm [thread:$0]  %s428_s25, 16, %s1157_s1, [#allocation3]   ;;  %v394_v58 = vadd.f32 %v393_v24, %v392_v52  ;;  %v280_v62 = vmul.f32 %v1023_v11, %v1023_v11  ;;  %v397_v5 = vsel %vm84_vm1, %v278_v23, 0.0  ;;  %v281_v30 = vmul.f32 %v1033_v13, %v1033_v13  ;;  %v221_v57 = vld [vmem:[#allocation4] sm:$0x1] }
  0x99   :  { %v399_v32 = vsel %vm84_vm1, %v279_v26, 0.0  ;;  %v282_v35 = vmul.f32 %v1043_v16, %v1043_v16  ;;  %v283_v39 = vmul.f32 %v1053_v19, %v1053_v19  ;;  %v284_v42 = vmul.f32 %v1063_v22, %v1063_v22  ;;  %s502_s1 = smov [#allocation4]  }
  0x9a   :  { %v396_v29 = vadd.f32 %v395_v27, %v394_v58  ;;  %v401_v36 = vsel %vm84_vm1, %v280_v62, 0.0  ;;  %v403_v11 = vsel %vm84_vm1, %v281_v30, 0.0  ;;  %v285_v45 = vmul.f32 %v1073_v25, %v1073_v25  ;;  %s437_s9 = sshll.u32 %s502_s1, 4  ;;  %s438_s9 = int_to_ptr.vmem [resolvable:$true] %s437_s9 }
  0x9b   :  { %v405_v13 = vsel %vm84_vm1, %v282_v35, 0.0  ;;  %v407_v16 = vsel %vm84_vm1, %v283_v39, 0.0  ;;  %v409_v48 = vsel %vm84_vm1, %v284_v42, 0.0  ;;  %s474_s10 = scalar_lea.vmem %s438_s9, 16  ;;  %s478_s11 = scalar_lea.vmem %s438_s9, 32 }
  0x9c   :  { %v398_v33 = vadd.f32 %v397_v5, %v396_v29  ;;  %v411_v19 = vsel %vm84_vm1, %v285_v45, 0.0  ;;  %p475_p8 = scmp.ne.s32.totalorder %s438_s9, %s474_s10  ;;  %p479_p9 = scmp.lt.s32.totalorder %s438_s9, %s438_s9 }
  0x9d   :  { %p480_p10 = scmp.lt.s32.totalorder %s478_s11, %s474_s10 }
  0x9e   :  { %v400_v38 = vadd.f32 %v399_v32, %v398_v33 }
  0x9f   :  { %p481_p11 = por %p480_p10, %p479_p9 }
  0xa0   :  { %v402_v41 = vadd.f32 %v401_v36, %v400_v38 }
  0xa1   :  { %p482_p12 = pnand %p481_p11, %p475_p8 }
  0xa2   :  { %v404_v44 = vadd.f32 %v403_v11, %v402_v41 }
  0xa4   :  { %v406_v47 = vadd.f32 %v405_v13, %v404_v44 }
  0xa6   :  { %v408_v50 = vadd.f32 %v407_v16, %v406_v47 }
  0xa8   :  { %v410_v51 = vadd.f32 %v409_v48, %v408_v50 }
  0xaa   :  { %v412_v53 = vadd.f32 %v411_v19, %v410_v51 }
  0xac   :  { %v413_v28 = vrot.slane %v412_v53, 4 }
  0xae   :  { %v414_v54 = vadd.f32 %v413_v28, %v412_v53 }
  0xb0   :  { %v415_v55 = vrot.slane %v414_v54, 2 }
  0xb2   :  { %v416_v22 = vadd.f32 %v415_v55, %v414_v54 }
  0xb4   :  { %v417_v56 = vrot.slane %v416_v22, 1 }
  0xb6   :  { %v418_v59 = vadd.f32 %v417_v56, %v416_v22 }
  0xb8   :  { %v419_v25 = vadd.f32 %v418_v59, %v221_v57 }
  0xba   :  { %420 = vst.msk [vmem:[#allocation4] sm:$0x1] %vm16_vm0, %v419_v25 }
  0xbb   :  { %485 = shalt.err (!%p482_p12)
}
  0xbc   :  { %s486_s14 = scalar_lea.hbm %s1158_s2, 16 }
  0xbd   :  { %p487_p13 = scmp.ne.s32.totalorder %s1158_s2, %s486_s14  ;;  %p490_p0 = scmp.lt.u32.totalorder %s486_s14, %s1158_s2 }
  0xbf   :  { %p492_p1 = pnand %p490_p0, %p487_p13 }
  0xc1   :  { %495 = shalt.err (!%p492_p1)
}
  0xc2   :  { %440 = dma.vmem_to_hbm [thread:$0]  %s438_s9, 16, %s1158_s2, [#allocation5]  }
  0xc3   :  { %496 = dma.done.wait [#allocation3], 16  }
  0xc4   :  { %497 = vsyncadd [#allocation3], 4294967280 }
  0xc5   :  { %498 = dma.done.wait [#allocation5], 16  }
  0xc6   :  { %499 = vsyncadd [#allocation5], 4294967280 }
  0xc7   :  { %447 = vsyncpa [#allocation3], 1 }
  0xc8   :  { %448 = vsyncpa [#allocation5], 1 }

</bundles_post_ra>
